<compile_context>
chip_gen: v7x
topology: tpu7x:2x2x1
jax: 0.10.0
libtpu: 0.0.40
codegen_flags: <defaults>
</compile_context>

<pallas_src>
import jax
import jax.numpy as jnp
from jax import lax
from jax.experimental import pallas as pl
from jax.experimental.pallas import tpu as pltpu


# --------------------------------------------------------------------------- kernels
def _bn_stats_kernel(x_ref, w1_ref, stats_ref):
    """Per-block partial BN statistics of the conv1 output.

    x_ref:     (C, tile_hw)    channel-major pixel block
    w1_ref:    (proj, C)       conv1 weight
    stats_ref: (proj, 2)       [:, 0] = sum(y1), [:, 1] = sum(y1^2) over this block
    """
    y1 = jnp.dot(w1_ref[...], x_ref[...], preferred_element_type=jnp.float32)  # (proj, thw)
    s = jnp.sum(y1, axis=1, keepdims=True)          # (proj, 1)  lane-axis reduce (XLU)
    ss = jnp.sum(y1 * y1, axis=1, keepdims=True)    # (proj, 1)
    stats_ref[...] = jnp.concatenate([s, ss], axis=1)


def _bn_apply_kernel(x_ref, w1s_ref, w2_ref, shift_ref, o_ref):
    """conv1 (BN scale pre-folded into w1) -> +shift -> ReLU -> conv2 for one pixel block.

    x_ref: (C, tile_hw); w1s_ref: (proj, C) = scale*w1; w2_ref: (out2, proj);
    shift_ref: (proj, 1); o_ref: (out2, tile_hw)
    """
    y1 = jnp.dot(w1s_ref[...], x_ref[...], preferred_element_type=jnp.float32)  # (proj, thw)
    z = jnp.maximum(y1 + shift_ref[...], 0.0)                                    # BN shift + ReLU
    o_ref[...] = jnp.dot(w2_ref[...], z,
                         preferred_element_type=jnp.float32).astype(o_ref.dtype)


# --------------------------------------------------------------------------- wrapper
def _pick_tile_hw(hw, rows, max_tile=2048, budget_bytes=16 << 20):
    """Largest multiple of 128 dividing hw, capped by max_tile and a VMEM budget.

    rows ~ number of f32 rows live per pixel column (input + output + temps),
    double-buffered => ~8*rows bytes per lane.
    """
    cap = max(128, ((budget_bytes // max(8 * rows, 1)) // 128) * 128)
    t = (min(hw, max_tile, cap) // 128) * 128
    while t >= 128:
        if hw % t == 0:
            return t
        t -= 128
    return hw  # small / non-128-multiple spatial extents: take the whole thing


def binary_head_block(x_nchw, w1, gamma, beta, w2, *, eps=1e-5, max_tile_hw=2048):
    """x_nchw: (N, C_in, H, W); w1: (proj, C_in); w2: (2*out, proj); gamma/beta: (proj,)."""
    N, C, H, W = x_nchw.shape
    proj = w1.shape[0]
    out2 = w2.shape[0]
    assert out2 % 2 == 0
    out_channels = out2 // 2
    HW = H * W

    tile_hw = _pick_tile_hw(HW, C + out2 + 2 * proj, max_tile_hw)
    nb = HW // tile_hw

    # Free reshape only -- stays channel-major, no HBM transpose passes.
    x = x_nchw.reshape(N, C, HW).astype(jnp.float32)
    w1f = jnp.asarray(w1, jnp.float32)                 # (proj, C)
    w2f = jnp.asarray(w2, jnp.float32)                 # (out2, proj)

    cparams = pltpu.CompilerParams(
        dimension_semantics=("parallel", "parallel"),
        vmem_limit_bytes=64 * 1024 * 1024,
    )

    # ---- pass 1: partial BN statistics per (batch, spatial block) ----------------
    partial = pl.pallas_call(
        _bn_stats_kernel,
        out_shape=jax.ShapeDtypeStruct((N, nb, proj, 2), jnp.float32),
        grid_spec=pltpu.PrefetchScalarGridSpec(
            num_scalar_prefetch=0,
            grid=(N, nb),
            in_specs=[
                pl.BlockSpec((None, C, tile_hw), lambda n, b: (n, 0, b)),
                pl.BlockSpec((proj, C), lambda n, b: (0, 0)),
            ],
            out_specs=pl.BlockSpec((None, None, proj, 2), lambda n, b: (n, b, 0, 0)),
        ),
        compiler_params=cparams,
    )(x, w1f)

    # Tiny reduction + BN fold in plain JAX (proj elements).
    totals = jnp.sum(partial, axis=(0, 1))                       # (proj, 2)
    count = jnp.float32(N * HW)
    mean = totals[:, 0] / count
    var = jnp.maximum(totals[:, 1] / count - mean * mean, 0.0)   # biased var (train BN), clamped
    scale = jnp.asarray(gamma, jnp.float32) * lax.rsqrt(var + jnp.float32(eps))
    shift = (jnp.asarray(beta, jnp.float32) - mean * scale).reshape(proj, 1)
    w1_scaled = scale.reshape(proj, 1) * w1f                     # fold BN scale into conv1 weight

    # ---- pass 2: conv1(scaled) + shift + ReLU + conv2, lane-dense output ---------
    out = pl.pallas_call(
        _bn_apply_kernel,
        out_shape=jax.ShapeDtypeStruct((N, out2, HW), jnp.float32),
        grid_spec=pltpu.PrefetchScalarGridSpec(
            num_scalar_prefetch=0,
            grid=(N, nb),
            in_specs=[
                pl.BlockSpec((None, C, tile_hw), lambda n, b: (n, 0, b)),
                pl.BlockSpec((proj, C), lambda n, b: (0, 0)),
                pl.BlockSpec((out2, proj), lambda n, b: (0, 0)),
                pl.BlockSpec((proj, 1), lambda n, b: (0, 0)),
            ],
            out_specs=pl.BlockSpec((None, out2, tile_hw), lambda n, b: (n, 0, b)),
        ),
        compiler_params=cparams,
    )(x, w1_scaled, w2f, shift)

    # (N, 2*out, H*W) -> (N, 2, out, H, W): matches .view(N, 2, -1, H, W); free reshape.
    return out.reshape(N, 2, out_channels, H, W)


# --------------------------------------------------------------------------- reference
def _reference(x, w1, gamma, beta, w2, eps=1e-5):
    N, C, H, W = x.shape
    y1 = jnp.einsum('nchw,pc->nphw', x, w1)
    mean = jnp.mean(y1, axis=(0, 2, 3), keepdims=True)
    var = jnp.mean((y1 - mean) ** 2, axis=(0, 2, 3), keepdims=True)   # biased variance
    z = (y1 - mean) * lax.rsqrt(var + eps)
    z = z * gamma.reshape(1, -1, 1, 1) + beta.reshape(1, -1, 1, 1)
    z = jnp.maximum(z, 0.0)
    y2 = jnp.einsum('nphw,op->nohw', z, w2)
    return y2.reshape(N, 2, -1, H, W)


if __name__ == "__main__":
    key = jax.random.PRNGKey(0)
    k_x, k_w1, k_w2, k_g, k_b = jax.random.split(key, 5)

    N, C_in, H, W = 2, 4, 16, 16
    proj_channels, out_channels = 8, 3

    x = jax.random.normal(k_x, (N, C_in, H, W), jnp.float32)
    w1 = jax.random.normal(k_w1, (proj_channels, C_in), jnp.float32) * 0.1
    w2 = jax.random.normal(k_w2, (2 * out_channels, proj_channels), jnp.float32) * 0.1
    gamma = 1.0 + 0.1 * jax.random.normal(k_g, (proj_channels,), jnp.float32)
    beta = 0.1 * jax.random.normal(k_b, (proj_channels,), jnp.float32)

    out = binary_head_block(x, w1, gamma, beta, w2)
    out = jax.block_until_ready(out)

    ref = _reference(x, w1, gamma, beta, w2)
    assert out.shape == (N, 2, out_channels, H, W), out.shape
    assert jnp.allclose(out, ref, rtol=1e-4, atol=1e-4), float(jnp.max(jnp.abs(out - ref)))

    print("KERNEL_OK")
</pallas_src>

<mosaic_0001>
module attributes {stable_mosaic.version = 11 : i64} {
  func.func @_bn_stats_kernel(%arg0: i32, %arg1: i32, %arg2: memref<1x4x256xf32, #tpu.memory_space<vmem>>, %arg3: memref<8x4xf32, #tpu.memory_space<vmem>>, %arg4: memref<1x1x8x2xf32, #tpu.memory_space<vmem>>) attributes {dimension_semantics = [#tpu.dimension_semantics<parallel>, #tpu.dimension_semantics<parallel>], iteration_bounds = array<i64: 2, 1>, scalar_prefetch = 0 : i64, scratch_operands = 0 : i64, tpu.core_type = #tpu.core_type<tc>, window_params = [{transform_indices = @transform_0, window_bounds = array<i64: 1, 4, 256>}, {pipeline_mode = #tpu.pipeline_mode<synchronous>, transform_indices = @transform_1, window_bounds = array<i64: 8, 4>}, {transform_indices = @transform_2, window_bounds = array<i64: 1, 1, 8, 2>}]} {
    %c0 = arith.constant 0 : index
    %c0_0 = arith.constant 0 : index
    %0 = vector.load %arg3[%c0, %c0_0] : memref<8x4xf32, #tpu.memory_space<vmem>>, vector<8x4xf32>
    %c0_1 = arith.constant 0 : index
    %c0_2 = arith.constant 0 : index
    %c0_3 = arith.constant 0 : index
    %1 = vector.load %arg2[%c0_1, %c0_2, %c0_3] : memref<1x4x256xf32, #tpu.memory_space<vmem>>, vector<1x4x256xf32>
    %2 = vector.shape_cast %1 : vector<1x4x256xf32> to vector<4x256xf32>
    %cst = arith.constant dense<0.000000e+00> : vector<8x256xf32>
    %3 = tpu.matmul %0, %2, %cst {dimension_numbers = #tpu.dot_dimension_numbers<[1], [0], [0], [1], [0, 0, 1, 1], [], []>} : vector<8x4xf32>, vector<4x256xf32>, vector<8x256xf32> -> vector<8x256xf32>
    %cst_4 = arith.constant dense<0.000000e+00> : vector<8xf32>
    %4 = vector.multi_reduction <add>, %3, %cst_4 [1] : vector<8x256xf32> to vector<8xf32>
    %5 = vector.shape_cast %4 : vector<8xf32> to vector<8x1xf32>
    %6 = arith.mulf %3, %3 : vector<8x256xf32>
    %cst_5 = arith.constant dense<0.000000e+00> : vector<8xf32>
    %7 = vector.multi_reduction <add>, %6, %cst_5 [1] : vector<8x256xf32> to vector<8xf32>
    %8 = vector.shape_cast %7 : vector<8xf32> to vector<8x1xf32>
    %9 = tpu.concatenate %5, %8 in 1 : vector<8x1xf32>, vector<8x1xf32> -> vector<8x2xf32>
    %c0_6 = arith.constant 0 : index
    %c0_7 = arith.constant 0 : index
    %c0_8 = arith.constant 0 : index
    %c0_9 = arith.constant 0 : index
    %10 = vector.load %arg4[%c0_6, %c0_7, %c0_8, %c0_9] : memref<1x1x8x2xf32, #tpu.memory_space<vmem>>, vector<1x1x8x2xf32>
    %11 = vector.shape_cast %10 : vector<1x1x8x2xf32> to vector<8x2xf32>
    %12 = vector.shape_cast %9 : vector<8x2xf32> to vector<1x1x8x2xf32>
    tpu.vector_store %arg4[%c0_6, %c0_7, %c0_8, %c0_9], %12 {strides = array<i32>} : memref<1x1x8x2xf32, #tpu.memory_space<vmem>>, vector<1x1x8x2xf32>,
    return
  }
  func.func @transform_0(%arg0: i32, %arg1: i32) -> (i32, i32, i32) {
    %c0_i32 = arith.constant 0 : i32
    %c0_i32_0 = arith.constant 0 : i32
    return %arg0, %c0_i32, %arg1 : i32, i32, i32
  }
  func.func @transform_1(%arg0: i32, %arg1: i32) -> (i32, i32) {
    %c0_i32 = arith.constant 0 : i32
    %c0_i32_0 = arith.constant 0 : i32
    %c0_i32_1 = arith.constant 0 : i32
    return %c0_i32, %c0_i32_0 : i32, i32
  }
  func.func @transform_2(%arg0: i32, %arg1: i32) -> (i32, i32, i32, i32) {
    %c0_i32 = arith.constant 0 : i32
    %c0_i32_0 = arith.constant 0 : i32
    %c0_i32_1 = arith.constant 0 : i32
    return %arg0, %arg1, %c0_i32, %c0_i32_0 : i32, i32, i32, i32
  }
}

</mosaic_0001>

<bundles_post_ra>
// kernel: tpu_custom_call.1
= control target key start
LH: loop header
LB: loop body
LE: loop exit
PB: predicated region body
PF: predicated region fallthrough
CT: control target
= control target key end

     0   :  { %7 = vsyncpa [#allocation3], 0  ;;  %s871_s0 = inlined_call_operand.hbm [shape: f32[2,4,256], index: 0, kind: input, shape index: {}]   ;;  %s872_s1 = inlined_call_operand.hbm [shape: f32[8,4], index: 1, kind: input, shape index: {}]   ;;  %s873_s2 = inlined_call_operand.hbm [shape: f32[2,1,8,2], index: 2, kind: output, shape index: {}]  }
   0x1   :  { %9 = vsyncpa [#allocation3 + $0x1], 0 }
   0x2   :  { %10 = vsyncpa [#allocation6], 0 }
   0x3   :  { %11 = vsyncpa [#allocation4], 0 }
   0x4   :  { %13 = vsyncpa [#allocation4 + $0x1], 0  ;;  %s655_s9 = smov 0   ;;  %s657_s10 = smov 0  }
   0x5   :  { %s659_s11 = smov 0   ;;  %s661_s12 = smov 0  }
   0x6   :  { %s663_s13 = smov 0   ;;  %s665_s14 = smov 0  }
   0x7 LB: > { %s395_s15 = sadd.s32 4294967295, %s634_s14   ;;  %s396_s16 = sadd.s32 4294967294, %s634_s14   ;;  %s634_s14 = sphi %s665_s14, %s19_s14   ;;  %s630_s13 = sphi %s663_s13, %s898_s13   ;;  %s626_s12 = sphi %s661_s12, %s897_s12   ;;  %s622_s11 = sphi %s659_s11, %s896_s11   ;;  %s618_s10 = sphi %s657_s10, %s895_s10   ;;  %s614_s9 = sphi %s655_s9, %s894_s9  }
   0x8   : > { %p53_p0 = scmp.ne.s32.totalorder %s618_s10, %s614_s9  ;;  %p689_p1 = scmp.eq.s32.totalorder %s395_s15, 0 }
   0x9   : > { %p693_p2 = scmp.eq.s32.totalorder %s395_s15, 1  ;;  %p106_p3 = scmp.eq.s32.totalorder %s396_s16, 1 }
   0xa   : > { %s878_s17 = scalar_select %p689_p1, 1, 0 }
   0xb   : > { %s879_s18 = scalar_select %p693_p2, 1, 0 }
   0xc   : > { %p699_p4 = por %p689_p1, %p53_p0  ;;  %p397_p5 = scmp.ge.s32.totalorder %s634_s14, 1 }
   0xd   : > { %p704_p6 = por %p106_p3, %p53_p0  ;;  %p113_p7 = scmp.lt.s32.totalorder %s634_s14, 3 }
   0xe   : > { %s880_s19 = scalar_select %p699_p4, 1, 0 }
   0xf   : > { %s881_s20 = scalar_select %p704_p6, 1, 0 }
  0x10   : > { %p709_p8 = pnand %p397_p5, %p113_p7  ;;  %s636_s22 = smov [#allocation5]  }
  0x11   : > { %s126_s23 = sshll.u32 %s636_s22, 4  ;;  %s31_s25 = sadd.s32 1, %s630_s13  ;;  %s127_s23 = int_to_ptr.vmem [resolvable:$true] %s126_s23 }
  0x12   : > { %s882_s21 = scalar_select %p709_p8, 1, 0 }
  0x13   : > { %p423_p10 = pneg %p709_p8  ;;  %s40_s26 = sadd.s32 1, %s622_s11 }
  0x14   : > { %p724_p12 = scmp.ge.s32.totalorder %s31_s25, 2  ;;  %s490_s30 = scalar_lea.hbm %s872_s1, 128 }
  0x15   : > { %p718_p11 = pnand %p423_p10, %p689_p1  ;;  %p491_p13 = scmp.ne.s32.totalorder %s872_s1, %s490_s30 }
  0x16   : > { %s884_s27 = scalar_select %p724_p12, 1, 0 }
  0x17   : > { %p492_p0 = pneg %p718_p11  ;;  %p497_p7 = scmp.lt.u32.totalorder %s490_s30, %s872_s1 }
  0x19   : > { %p493_p3 = pnand %p492_p0, %p491_p13 }
  0x1b   : > { %p494_p5 = pneg %p493_p3 }
  0x1d   : > { %p499_p10 = pnand %p497_p7, %p494_p5 }
  0x1f   : > { %502 = shalt.err (!%p499_p10)
}
  0x20   : > { %s503_s7 = scalar_lea.vmem %s127_s23, 128  ;;  %p511_p4 = scmp.lt.s32.totalorder %s127_s23, %s127_s23 }
  0x21   : > { %p504_p9 = scmp.ne.s32.totalorder %s127_s23, %s503_s7  ;;  %p512_p8 = scmp.lt.s32.totalorder %s503_s7, %s503_s7 }
  0x23   : > { %p506_p6 = pnand %p504_p9, %p492_p0  ;;  %p513_p2 = por %p512_p8, %p511_p4 }
  0x25   : > { %p507_p1 = pneg %p506_p6 }
  0x27   : > { %p514_p12 = pnand %p513_p2, %p507_p1 }
  0x29   : > { %517 = shalt.err (!%p514_p12)
}
  0x2a   : > { %426 = dma.hbm_to_vmem [thread:$0]  (!%p718_p11), %s872_s1, 128, %s127_s23, [#allocation6]  }
  0x2b   : > { %p885_p4 = scmp.ne.s32.totalorder %s884_s27, 0  ;;  %p47_p1 = scmp.ne.s32.totalorder %s622_s11, %s618_s10 }
  0x2c   : > { %p48_p2 = scmp.eq.s32.totalorder %s634_s14, 0  ;;  %p436_p6 = scmp.lt.s32.totalorder %s634_s14, 2 }
  0x2d   : > { %s900_s25 = smov (%p885_p4, %s31_s25), 0  ;;  %p886_p12 = scmp.ne.s32.totalorder %s879_s18, 0 }
  0x2e   : > { %s35_s16 = ssub.s32 %s630_s13, %s900_s25  ;;  %p49_p9 = por %p48_p2, %p47_p1 }
  0x2f   : > { %p38_p8 = scmp.eq.s32.totalorder %s35_s16, 0  ;;  %p756_p13 = por %p886_p12, %p47_p1 }
  0x30   : > { %s137_s24 = sand.u32 1, %s622_s11   ;;  %s414_s27 = sshll.u32 %s630_s13, 7 }
  0x31   : > { %s764_s28 = scalar_select %p38_p8, %s622_s11, %s40_s26  }
  0x32   : > { %s400_s23 = sshll.u32 %s137_s24, 3  ;;  %s770_s3 = scalar_lea.hbm %s871_s0, %s414_s27 }
  0x33   : > { %s141_s18 = scalar_lea.vmem [#allocation2], %s400_s23  ;;  %p774_p11 = pnand %p436_p6, %p49_p9 }
  0x34   : > { %s151_s4 = sshll.u32 %s141_s18, 4  ;;  %s138_s26 = scalar_lea.sflag [#allocation3], %s137_s24  ;;  %s772_s4 = int_to_ptr.vmem [resolvable:$true] %s151_s4 }
  0x35   : > { %s518_s6 = scalar_lea.hbm %s770_s3, 128  ;;  %p520_p3 = pneg %p774_p11 }
  0x36   : > { %p519_p0 = scmp.ne.s32.totalorder %s770_s3, %s518_s6  ;;  %s523_s15 = scalar_lea.hbm %s871_s0, 256 }
  0x37   : > { %p524_p10 = scmp.lt.u32.totalorder %s770_s3, %s871_s0  ;;  %p525_p4 = scmp.lt.u32.totalorder %s523_s15, %s518_s6 }
  0x38   : > { %p521_p5 = pnand %p520_p3, %p519_p0  ;;  %p527_p2 = scmp.lt.u32.totalorder %s518_s6, %s770_s3 }
  0x39   : > { %p526_p1 = por %p525_p4, %p524_p10 }
  0x3a   : > { %p522_p7 = pneg %p521_p5 }
  0x3b   : > { %p528_p6 = por %p527_p2, %p526_p1 }
  0x3d   : > { %p529_p8 = pnand %p528_p6, %p522_p7 }
  0x3f   : > { %532 = shalt.err (!%p529_p8)
}
  0x40   : > { %s533_s24 = scalar_lea.vmem %s772_s4, 128  ;;  %s637_s27 = smov [#allocation2]  }
  0x41   : > { %p534_p9 = scmp.ne.s32.totalorder %s772_s4, %s533_s24  ;;  %s538_s29 = sshll.u32 %s637_s27, 4  ;;  %s539_s29 = int_to_ptr.vmem [resolvable:$false] %s538_s29 }
  0x42   : > { %s540_s30 = scalar_lea.vmem %s539_s29, 256  ;;  %p541_p5 = scmp.lt.s32.totalorder %s772_s4, %s539_s29 }
  0x43   : > { %p536_p12 = pnand %p534_p9, %p520_p3  ;;  %p542_p10 = scmp.lt.s32.totalorder %s540_s30, %s533_s24 }
  0x45   : > { %p537_p0 = pneg %p536_p12  ;;  %p543_p4 = por %p542_p10, %p541_p5 }
  0x47   : > { %p544_p1 = pnand %p543_p4, %p537_p0 }
  0x49   : > { %547 = shalt.err (!%p544_p1)
}
  0x4a   : > { %430 = dma.hbm_to_vmem [thread:$0]  (!%p774_p11), %s770_s3, 128, %s772_s4, %s138_s26  }
  0x4b   : > { %p889_p7 = scmp.ne.s32.totalorder %s882_s21, 0 }
  0x4c   : > { %s806_s18 = sand.u32 (!%p889_p7), 1, %s618_s10   ;;  %p890_p3 = scmp.ne.s32.totalorder (!%p889_p7), %s880_s19, 0 }
  0x4d   : > { %160 = sbr.rel (%p889_p7) target bundleno = 469 (0x1d5), region = 28  ;;  %s404_s6 = sshll.u32 (!%p889_p7), %s806_s18, 3 }
  0x4e   : > { %s163_s7 = scalar_lea.sflag (!%p889_p7), [#allocation3], %s806_s18  ;;  %s166_s8 = scalar_lea.vmem (!%p889_p7), [#allocation2], %s404_s6 }
  0x54   : > { %601 = dma.done.wait (%p890_p3), %s163_s7, 128  }
  0x55   : > { %603 = vsyncadd (%p890_p3), %s163_s7, 4294967168  ;;  %p891_p2 = scmp.ne.s32.totalorder %s878_s17, 0 }
  0x57   : > { %605 = dma.done.wait (%p891_p2), [#allocation6], 128  }
  0x58   : > { %607 = vsyncadd (%p891_p2), [#allocation6], 4294967168  ;;  %v638_v0 = vmov 0.0   ;;  %v193_v1 = vld [vmem:[%s166_s8] sm:$0xff]  ;;  %vm200_vm0 = vcmask 1043456   ;;  %v192_v3 = vld [vmem:[#allocation5] sm:$0xff] }
  0x59   : > { %269 = vmatprep.mubr.f32.mxu0 %v638_v0  ;;  %v195_v2 = vcombine.high %v193_v1, %v193_v1  ;;  %vm196_vm1 = vcmask 31744   ;;  %s411_s17 = sshll.u32 %s626_s12, 7  ;;  %s190_s19 = scalar_lea.vmem [#allocation7], %s404_s6  ;;  %vm284_vm2 = vcmask 7168   ;;  %vm286_vm3 = vcmask 15360  }
  0x5a   : > { %s303_s21 = sshll.u32 %s190_s19, 4  ;;  %s822_s5 = scalar_lea.hbm %s873_s2, %s411_s17  ;;  %s824_s21 = int_to_ptr.vmem [resolvable:$true] %s303_s21 }
  0x5b   : > { %407 = vmatprep.subr.msk.mxu0 %vm200_vm0, %v195_v2  ;;  %s289_s26 = scalar_lea.sflag [#allocation4], %s806_s18  ;;  %s548_s15 = scalar_lea.vmem %s824_s21, 128 }
  0x5c   : > { %408 = vmatpush1.msk.msra.mxu0 %vm200_vm0, %v193_v1  ;;  %p549_p11 = scmp.ne.s32.totalorder %s824_s21, %s548_s15  ;;  %s639_s12 = smov [#allocation7]  }
  0x5d   : > { %409 = vmatmul.mubr.msk.f32.vlgmr.msra.gmra.mrb[0].mxu0 %vm196_vm1, %v192_v3  ;;  %s552_s16 = sshll.u32 %s639_s12, 4  ;;  %s553_s16 = int_to_ptr.vmem [resolvable:$false] %s552_s16 }
  0x5e   : > { %p550_p6 = pnand %p549_p11, %p756_p13  ;;  %s554_s23 = scalar_lea.vmem %s553_s16, 256 }
  0x5f   : > { %p555_p9 = scmp.lt.s32.totalorder %s824_s21, %s553_s16  ;;  %p556_p12 = scmp.lt.s32.totalorder %s554_s23, %s548_s15 }
  0x60   : > { %p551_p8 = pneg %p550_p6 }
  0x61   : > { %p557_p0 = por %p556_p12, %p555_p9 }
  0x63   : > { %p558_p5 = pnand %p557_p0, %p551_p8 }
 0x130   : > { %v271_v4 = vpop.f32.mrb[0].mxu0 }
 0x131   : > { %v279_v5 = vmul.f32 %v271_v4, %v271_v4  ;;  %v273_v6 = vpop.f32.mrb[1].mxu0 }
 0x132   : > { %v280_v7 = vmul.f32 %v273_v6, %v273_v6  ;;  %v276_v8 = vadd.f32 %v273_v6, %v271_v4 }
 0x134   : > { %277 = vadd.xlane.f32.xlu0 %v276_v8  ;;  %v281_v9 = vadd.f32 %v280_v7, %v279_v5 }
 0x138   : > { %282 = vadd.xlane.f32.xlu0 %v281_v9 }
 0x1c1   : > { %v278_v10 = vpop.xlane.xlu0 %277 }
 0x1c5   : > { %v283_v11 = vpop.xlane.xlu0 %282 }
 0x1c6   : > { %v285_v12 = vsel %vm284_vm2, %v278_v10, %v283_v11 }
 0x1c7   : > { %287 = vst.msk [vmem:[%s190_s19] sm:$0xff] %vm286_vm3, %v285_v12 }
 0x1c8   : > { %561 = shalt.err (!%p558_p5)
}
 0x1c9   : > { %s562_s24 = scalar_lea.hbm %s822_s5, 128  ;;  %s566_s30 = scalar_lea.hbm %s873_s2, 256 }
 0x1ca   : > { %p563_p10 = scmp.ne.s32.totalorder %s822_s5, %s562_s24  ;;  %p567_p7 = scmp.lt.u32.totalorder %s822_s5, %s873_s2 }
 0x1cb   : > { %p568_p3 = scmp.lt.u32.totalorder %s566_s30, %s562_s24  ;;  %p570_p11 = scmp.lt.u32.totalorder %s562_s24, %s822_s5 }
 0x1cc   : > { %p564_p4 = pnand %p563_p10, %p756_p13 }
 0x1cd   : > { %p569_p2 = por %p568_p3, %p567_p7 }
 0x1ce   : > { %p565_p1 = pneg %p564_p4 }
 0x1cf   : > { %p571_p6 = por %p570_p11, %p569_p2 }
 0x1d1   : > { %p572_p8 = pnand %p571_p6, %p565_p1 }
 0x1d3   : > { %575 = shalt.err (!%p572_p8)
}
 0x1d4   : > { %421 = dma.vmem_to_hbm [thread:$0]  (%p756_p13), %s824_s21, 128, %s822_s5, %s289_s26  }
 0x1d5 PF: > { %s315_s7 = sand.u32 1, %s614_s9   ;;  %p892_p9 = scmp.ne.s32.totalorder %s881_s20, 0 }
 0x1d6   : > { %p893_p12 = scmp.ge.s32.totalorder %s634_s14, 2  ;;  %s316_s8 = scalar_lea.sflag [#allocation4], %s315_s7 }
 0x1d8   : > { %p432_p0 = pnand %p893_p12, %p892_p9 }
 0x1da   : > { %609 = dma.done.wait (!%p432_p0), %s316_s8, 128  }
 0x1db   : > { %611 = vsyncadd (!%p432_p0), %s316_s8, 4294967168  ;;  %s19_s14 = sadd.s32 1, %s634_s14   ;;  %s894_s9 = smov %s618_s10 }
 0x1dc   : > { %p16_p5 = scmp.ge.s32.totalorder %s19_s14, 4   ;;  %s895_s10 = smov %s622_s11 }
 0x1dd   : > { %s896_s11 = smov %s764_s28  ;;  %s897_s12 = smov %s630_s13 }
 0x1de   : > { %s898_s13 = smov %s900_s25  ;;  %18 = sbr.rel (!%p16_p5) target bundleno = 7 (0x7), region = 77 }
 0x1e5   :  { %321 = vsyncpa [#allocation3], 1 }
 0x1e6   :  { %323 = vsyncpa [#allocation3 + $0x1], 1 }
 0x1e7   :  { %324 = vsyncpa [#allocation6], 1 }
 0x1e8   :  { %325 = vsyncpa [#allocation4], 1 }
 0x1e9   :  { %327 = vsyncpa [#allocation4 + $0x1], 1 }

</bundles_post_ra>
